<compile_context>
chip_gen: v7x
topology: tpu7x:2x2x1
jax: 0.10.0
libtpu: 0.0.40
codegen_flags: <defaults>
</compile_context>

<pallas_src>
import jax
import jax.numpy as jnp
from jax.experimental import pallas as pl
from jax.experimental.pallas import tpu as pltpu  # noqa: F401  (TPU backend)

# ---- Config (mirrors the fields the module's __init__ / init_mems use) ----
VOCAB_SIZE = 64
D_EMBED = 32
D_MODEL = 32
N_HEAD = 2
D_HEAD = 16
N_LAYER = 2
MEM_LEN = 4


def _transpose_kernel(ids_ref, ids_t_ref):
    # input_ids.transpose(0, 1).contiguous()
    # Single whole-array 32-bit block, one grid step; the .T is one XLU op
    # (per the review, not worth micro-optimizing — the bottleneck is the
    # call boundary, which jit amortizes).
    ids_t_ref[...] = ids_ref[...].T


def _transpose_pallas(input_ids):
    bs, q_len = input_ids.shape
    return pl.pallas_call(
        _transpose_kernel,
        out_shape=jax.ShapeDtypeStruct((q_len, bs), input_ids.dtype),
        # Block dims == full array dims, so the (8,128) divisibility rule is
        # trivially satisfied and grid = () (a single invocation, no tiling).
        in_specs=[pl.BlockSpec((bs, q_len), lambda: (0, 0))],
        out_specs=pl.BlockSpec((q_len, bs), lambda: (0, 0)),
    )(input_ids)


@jax.jit
def transformer_xl_forward(word_emb, input_ids):
    """Equivalent of TransformerXLModel.forward.

    `word_emb` stands in for `next(self.parameters())` and only supplies the
    dtype/device for the zero mems (it is not otherwise consumed, exactly as
    in the reference forward).  Returns (ids_t, mems).
    """
    bs, q_len = input_ids.shape

    # --- The only on-device op in forward: the transpose (Pallas kernel). ---
    ids_t = _transpose_pallas(input_ids)

    # --- init_mems: zeros stay in plain XLA under jit (perf feedback: do not
    # burn Pallas VMEM->HBM store bandwidth writing zeros with no compute). ---
    zero_mem = jnp.zeros((MEM_LEN, bs, D_MODEL), dtype=word_emb.dtype)
    # List-of-layers semantics like the PyTorch module; all entries reference
    # the same (immutable) zero buffer -> no per-layer fill/copy.
    mems = [zero_mem] * N_LAYER

    # TODO(synk): the reference forward stops after mem init (no attention /
    # embedding layers are defined in this module), so no further compute exists.
    return ids_t, mems


if __name__ == "__main__":
    key = jax.random.PRNGKey(0)
    k_ids, k_emb = jax.random.split(key)

    bs, q_len = 2, 8
    input_ids = jax.random.randint(k_ids, (bs, q_len), 0, VOCAB_SIZE, dtype=jnp.int32)

    # Deterministic "parameter" (word embedding implied by vocab_size/d_embed).
    # It only determines the mems dtype, mirroring `next(self.parameters()).dtype`.
    word_emb = 0.02 * jax.random.normal(k_emb, (VOCAB_SIZE, D_EMBED), dtype=jnp.float32)

    ids_t, mems = transformer_xl_forward(word_emb, input_ids)
    jax.block_until_ready(ids_t)
    jax.block_until_ready(mems)

    # Correctness checks against the PyTorch semantics.
    assert ids_t.shape == (q_len, bs)
    assert bool((ids_t == jnp.transpose(input_ids)).all())
    assert len(mems) == N_LAYER
    for m in mems:
        assert m.shape == (MEM_LEN, bs, D_MODEL)
        assert m.dtype == word_emb.dtype
        assert float(jnp.abs(m).sum()) == 0.0

    print("KERNEL_OK")
</pallas_src>

<mosaic_0001>
module attributes {stable_mosaic.version = 11 : i64} {
  func.func @_transpose_kernel(%arg0: memref<2x8xi32, #tpu.memory_space<vmem>>, %arg1: memref<8x2xi32, #tpu.memory_space<vmem>>) attributes {dimension_semantics = [], scalar_prefetch = 0 : i64, scratch_operands = 0 : i64, tpu.core_type = #tpu.core_type<tc>} {
    %c0 = arith.constant 0 : index
    %c0_0 = arith.constant 0 : index
    %0 = vector.load %arg0[%c0, %c0_0] : memref<2x8xi32, #tpu.memory_space<vmem>>, vector<2x8xi32>
    %1 = tpu.transpose %0, [1, 0] : vector<2x8xi32> -> vector<8x2xi32>
    %c0_1 = arith.constant 0 : index
    %c0_2 = arith.constant 0 : index
    %2 = vector.load %arg1[%c0_1, %c0_2] : memref<8x2xi32, #tpu.memory_space<vmem>>, vector<8x2xi32>
    tpu.vector_store %arg1[%c0_1, %c0_2], %1 {strides = array<i32>} : memref<8x2xi32, #tpu.memory_space<vmem>>, vector<8x2xi32>,
    return
  }
}

</mosaic_0001>

<bundles_post_ra>
// kernel: transformer_xl_forward.1
= control target key start
LH: loop header
LB: loop body
LE: loop exit
PB: predicated region body
PF: predicated region fallthrough
CT: control target
= control target key end

     0   :  { %6 = vsyncpa [#allocation3], 0  ;;  %s86_s6 = smov [#allocation2]   ;;  %s112_s0 = inlined_call_operand.hbm [shape: s32[2,8], index: 0, kind: input, shape index: {}]   ;;  %s113_s1 = inlined_call_operand.vmem [shape: s32[8,2], index: 1, kind: output, shape index: {}]  }
   0x1   :  { %s13_s7 = sshll.u32 %s86_s6, 4  ;;  %s62_s10 = scalar_lea.hbm %s112_s0, 32  ;;  %s14_s7 = int_to_ptr.vmem [resolvable:$true] %s13_s7 }
   0x2   :  { %p63_p0 = scmp.ne.s32.totalorder %s112_s0, %s62_s10  ;;  %p66_p1 = scmp.lt.u32.totalorder %s62_s10, %s112_s0 }
   0x4   :  { %p68_p2 = pnand %p66_p1, %p63_p0 }
   0x6   :  { %71 = shalt.err (!%p68_p2)
}
   0x7   :  { %s72_s15 = scalar_lea.vmem %s14_s7, 32  ;;  %p77_p4 = scmp.lt.s32.totalorder %s14_s7, %s14_s7 }
   0x8   :  { %p73_p3 = scmp.ne.s32.totalorder %s14_s7, %s72_s15  ;;  %p78_p5 = scmp.lt.s32.totalorder %s72_s15, %s72_s15 }
   0xa   :  { %p79_p6 = por %p78_p5, %p77_p4 }
   0xc   :  { %p80_p7 = pnand %p79_p6, %p73_p3 }
   0xe   :  { %83 = shalt.err (!%p80_p7)
}
   0xf   :  { %16 = dma.hbm_to_vmem [thread:$0]  %s112_s0, 32, %s14_s7, [#allocation3]  }
  0x10   :  { %84 = dma.done.wait [#allocation3], 32  }
  0x11   :  { %85 = vsyncadd [#allocation3], 4294967264  ;;  %v20_v0 = vld [vmem:[#allocation2] sm:$0x3]  ;;  %vm53_vm0 = vcmask 15360  }
  0x12   :  { %21 = vxpose.xlu0.b32.start.end [1/1] (short) (narrow) %v20_v0, 8 }
  0x92   :  { %v37_v1 = vpop.trf.xlu0 }
  0x93   :  { %54 = vst.msk [vmem:[%s113_s1] sm:$0xff] %vm53_vm0, %v37_v1 }
  0x94   :  { %59 = vsyncpa [#allocation3], 1 }

</bundles_post_ra>
